<compile_context>
chip_gen: v6e
topology: v6e:2x2x1
jax: 0.10.0
libtpu: 0.0.40
codegen_flags: <defaults>
</compile_context>

<pallas_src>
import jax
import jax.numpy as jnp
from jax.experimental import pallas as pl
from jax.experimental.pallas import tpu as pltpu

_LANE = 128            # lane width / f32 tile minor dim
_SUBLANE = 8           # f32 sublane granule
_NEG_BIG = -1e30       # effective -inf for masked (padded) logits
_VMEM_BUDGET = 12 * 1024 * 1024   # conservative (fits v5e's 16 MiB default scope)


def _round_up(n, m):
    return ((n + m - 1) // m) * m


def _mlp_logsoftmax_kernel(x_ref, w1_ref, b1_ref, w2_ref, b2_ref, w3_ref, b3_ref,
                           o_ref):
    x = x_ref[...]

    # linear1 + clamp(min=0); dropout1 (p=0.2) is identity in eval mode.
    # TODO(synk): training-mode dropout would use pltpu.prng_seed + pltpu.prng_random_bits.
    h1 = jnp.dot(x, w1_ref[...], preferred_element_type=jnp.float32) + b1_ref[...]
    h1 = jnp.maximum(h1, 0.0)

    # linear2 + clamp(min=0); dropout2 (p=0.5) is identity in eval mode.
    h2 = jnp.dot(h1, w2_ref[...], preferred_element_type=jnp.float32) + b2_ref[...]
    h2 = jnp.maximum(h2, 0.0)

    # linear3.  Padded label columns come out as exactly b3 = -1e30 (padded w3
    # columns are zero), so no extra masking is needed before log_softmax.
    logits = jnp.dot(h2, w3_ref[...], preferred_element_type=jnp.float32) + b3_ref[...]

    # log_softmax over the label axis (dim=1).
    m = jnp.max(logits, axis=-1, keepdims=True)
    shifted = logits - m
    lse = jnp.log(jnp.sum(jnp.exp(shifted), axis=-1, keepdims=True))
    o_ref[...] = (shifted - lse).astype(o_ref.dtype)


def pad_params(params):
    """One-time host-side padding of weights/biases.

    Only the *output/feature* column dims (H, L) are padded to 128 lanes; w1 keeps
    its row dim = D_in so x never needs lane padding.  The padded b3 columns carry
    -1e30 so the padded logits never affect max/logsumexp (valid because linear3
    has no ReLU and the padded w3 columns are zero).
    """
    w1, b1 = params["w1"], params["b1"]   # [D_in, H], [1, H]
    w2, b2 = params["w2"], params["b2"]   # [H, H],    [1, H]
    w3, b3 = params["w3"], params["b3"]   # [H, L],    [1, L]
    D_in, H = w1.shape
    L = w3.shape[1]
    Hp, Lp = _round_up(H, _LANE), _round_up(L, _LANE)

    def pad2(a, rows, cols, fill=0.0):
        out = jnp.full((rows, cols), fill, a.dtype)
        return out.at[: a.shape[0], : a.shape[1]].set(a)

    return {
        "w1": pad2(w1, D_in, Hp), "b1": pad2(b1, 1, Hp),
        "w2": pad2(w2, Hp, Hp),   "b2": pad2(b2, 1, Hp),
        "w3": pad2(w3, Hp, Lp),   "b3": pad2(b3, 1, Lp, fill=_NEG_BIG),
        "dims": (D_in, H, L),
    }


def _pick_tile_b(requested, B8, D_in, Hp, Lp, weight_bytes):
    """Clamp the batch tile: no bigger than the (sublane-padded) batch, under the
    VMEM budget, and leaving >= 2 grid tiles when the batch is large (v7x megacore)."""
    tile_b = max(_SUBLANE, _round_up(min(requested, B8), _SUBLANE))

    def footprint(tb):
        # double-buffered x + out blocks, VMEM-resident weights (double-buffered),
        # plus intermediate f32 activations (h1/h2) for one tile.
        io = 2 * tb * D_in * 4 + 2 * tb * Lp * 4
        act = 2 * tb * Hp * 4
        return io + act + 2 * weight_bytes

    while tile_b > _SUBLANE and footprint(tile_b) > _VMEM_BUDGET:
        tile_b = max(_SUBLANE, _round_up(tile_b // 2, _SUBLANE))

    # Prefer >= 2 batch tiles (keeps both v7x TensorCores busy) once tiles are big.
    while tile_b >= 512 and pl.cdiv(B8, tile_b) < 2:
        tile_b = _round_up(tile_b // 2, _SUBLANE)

    return tile_b


def dropout_classifier_forward(x, padded_params, *, tile_b=1024):
    """x: [B, input_size] float32. padded_params: output of pad_params()."""
    D_in, H, L = padded_params["dims"]
    w1, b1 = padded_params["w1"], padded_params["b1"]
    w2, b2 = padded_params["w2"], padded_params["b2"]
    w3, b3 = padded_params["w3"], padded_params["b3"]
    Hp = w1.shape[1]
    Lp = w3.shape[1]

    B = x.shape[0]
    B8 = _round_up(B, _SUBLANE)
    weight_bytes = 4 * (w1.size + b1.size + w2.size + b2.size + w3.size + b3.size)
    tb = _pick_tile_b(tile_b, B8, D_in, Hp, Lp, weight_bytes)
    Bp = _round_up(B8, tb)

    # Pad the batch only when needed (no lane padding of D_in at all).
    xp = x.astype(jnp.float32)
    if Bp != B:
        xp = jnp.pad(xp, ((0, Bp - B), (0, 0)))

    grid = (Bp // tb,)
    out = pl.pallas_call(
        _mlp_logsoftmax_kernel,
        out_shape=jax.ShapeDtypeStruct((Bp, Lp), jnp.float32),
        grid=grid,
        in_specs=[
            # x: tiled over batch; last block dim == full array dim (no 128 pad).
            pl.BlockSpec((tb, D_in), lambda i: (i, 0)),
            # Weights/biases: constant index_maps -> DMA'd once, stay VMEM-resident.
            pl.BlockSpec((D_in, Hp), lambda i: (0, 0)),
            pl.BlockSpec((1, Hp), lambda i: (0, 0)),
            pl.BlockSpec((Hp, Hp), lambda i: (0, 0)),
            pl.BlockSpec((1, Hp), lambda i: (0, 0)),
            pl.BlockSpec((Hp, Lp), lambda i: (0, 0)),
            pl.BlockSpec((1, Lp), lambda i: (0, 0)),
        ],
        out_specs=pl.BlockSpec((tb, Lp), lambda i: (i, 0)),
        compiler_params=pltpu.CompilerParams(
            dimension_semantics=("parallel",),  # batch tiles independent -> megacore
        ),
    )(xp, w1, b1, w2, b2, w3, b3)

    return out[:B, :L]


def init_params(key, input_size, hidden_size, num_labels):
    """Deterministic, PyTorch-Linear-style uniform init. Weights stored as [in, out]."""
    ks = jax.random.split(key, 6)

    def linear_init(kw, kb, fan_in, fan_out):
        bound = 1.0 / jnp.sqrt(float(fan_in))
        w = jax.random.uniform(kw, (fan_in, fan_out), jnp.float32, -bound, bound)
        b = jax.random.uniform(kb, (1, fan_out), jnp.float32, -bound, bound)
        return w, b

    w1, b1 = linear_init(ks[0], ks[1], input_size, hidden_size)
    w2, b2 = linear_init(ks[2], ks[3], hidden_size, hidden_size)
    w3, b3 = linear_init(ks[4], ks[5], hidden_size, num_labels)
    return {"w1": w1, "b1": b1, "w2": w2, "b2": b2, "w3": w3, "b3": b3}


def _reference_forward(x, p):
    h1 = jnp.maximum(x @ p["w1"] + p["b1"], 0.0)
    h2 = jnp.maximum(h1 @ p["w2"] + p["b2"], 0.0)
    z = h2 @ p["w3"] + p["b3"]
    return jax.nn.log_softmax(z, axis=1)


if __name__ == "__main__":
    key = jax.random.PRNGKey(0)
    k_x, k_p = jax.random.split(key)

    B, input_size, hidden_size, num_labels = 8, 32, 32, 16
    x = jax.random.normal(k_x, (B, input_size), jnp.float32)
    params = init_params(k_p, input_size, hidden_size, num_labels)
    padded = pad_params(params)

    out = dropout_classifier_forward(x, padded)
    out = jax.block_until_ready(out)

    ref = _reference_forward(x, params)
    assert out.shape == (B, num_labels)
    assert jnp.allclose(out, ref, atol=1e-5, rtol=1e-5), "mismatch vs JAX reference"

    print("KERNEL_OK")
</pallas_src>

<mosaic_0001>
module attributes {stable_mosaic.version = 11 : i64} {
  func.func @_mlp_logsoftmax_kernel(%arg0: i32, %arg1: memref<8x32xf32, #tpu.memory_space<vmem>>, %arg2: memref<32x128xf32, #tpu.memory_space<vmem>>, %arg3: memref<1x128xf32, #tpu.memory_space<vmem>>, %arg4: memref<128x128xf32, #tpu.memory_space<vmem>>, %arg5: memref<1x128xf32, #tpu.memory_space<vmem>>, %arg6: memref<128x128xf32, #tpu.memory_space<vmem>>, %arg7: memref<1x128xf32, #tpu.memory_space<vmem>>, %arg8: memref<8x128xf32, #tpu.memory_space<vmem>>) attributes {dimension_semantics = [#tpu.dimension_semantics<parallel>], iteration_bounds = array<i64: 1>, scalar_prefetch = 0 : i64, scratch_operands = 0 : i64, tpu.core_type = #tpu.core_type<tc>, window_params = [{transform_indices = @transform_0, window_bounds = array<i64: 8, 32>}, {pipeline_mode = #tpu.pipeline_mode<synchronous>, transform_indices = @transform_1, window_bounds = array<i64: 32, 128>}, {pipeline_mode = #tpu.pipeline_mode<synchronous>, transform_indices = @transform_2, window_bounds = array<i64: 1, 128>}, {pipeline_mode = #tpu.pipeline_mode<synchronous>, transform_indices = @transform_3, window_bounds = array<i64: 128, 128>}, {pipeline_mode = #tpu.pipeline_mode<synchronous>, transform_indices = @transform_4, window_bounds = array<i64: 1, 128>}, {pipeline_mode = #tpu.pipeline_mode<synchronous>, transform_indices = @transform_5, window_bounds = array<i64: 128, 128>}, {pipeline_mode = #tpu.pipeline_mode<synchronous>, transform_indices = @transform_6, window_bounds = array<i64: 1, 128>}, {transform_indices = @transform_7, window_bounds = array<i64: 8, 128>}]} {
    %c0 = arith.constant 0 : index
    %c0_0 = arith.constant 0 : index
    %0 = vector.load %arg1[%c0, %c0_0] : memref<8x32xf32, #tpu.memory_space<vmem>>, vector<8x32xf32>
    %c0_1 = arith.constant 0 : index
    %c0_2 = arith.constant 0 : index
    %1 = vector.load %arg2[%c0_1, %c0_2] : memref<32x128xf32, #tpu.memory_space<vmem>>, vector<32x128xf32>
    %cst = arith.constant dense<0.000000e+00> : vector<8x128xf32>
    %2 = tpu.matmul %0, %1, %cst {dimension_numbers = #tpu.dot_dimension_numbers<[1], [0], [0], [1], [0, 0, 1, 1], [], []>} : vector<8x32xf32>, vector<32x128xf32>, vector<8x128xf32> -> vector<8x128xf32>
    %c0_3 = arith.constant 0 : index
    %c0_4 = arith.constant 0 : index
    %3 = vector.load %arg3[%c0_3, %c0_4] : memref<1x128xf32, #tpu.memory_space<vmem>>, vector<1x128xf32>
    %4 = vector.broadcast %3 : vector<1x128xf32> to vector<8x128xf32>
    %5 = arith.addf %2, %4 : vector<8x128xf32>
    %cst_5 = arith.constant 0.000000e+00 : f32
    %6 = vector.broadcast %cst_5 : f32 to vector<8x128xf32>
    %7 = arith.maximumf %5, %6 : vector<8x128xf32>
    %c0_6 = arith.constant 0 : index
    %c0_7 = arith.constant 0 : index
    %8 = vector.load %arg4[%c0_6, %c0_7] : memref<128x128xf32, #tpu.memory_space<vmem>>, vector<128x128xf32>
    %cst_8 = arith.constant dense<0.000000e+00> : vector<8x128xf32>
    %9 = tpu.matmul %7, %8, %cst_8 {dimension_numbers = #tpu.dot_dimension_numbers<[1], [0], [0], [1], [0, 0, 1, 1], [], []>} : vector<8x128xf32>, vector<128x128xf32>, vector<8x128xf32> -> vector<8x128xf32>
    %c0_9 = arith.constant 0 : index
    %c0_10 = arith.constant 0 : index
    %10 = vector.load %arg5[%c0_9, %c0_10] : memref<1x128xf32, #tpu.memory_space<vmem>>, vector<1x128xf32>
    %11 = vector.broadcast %10 : vector<1x128xf32> to vector<8x128xf32>
    %12 = arith.addf %9, %11 : vector<8x128xf32>
    %cst_11 = arith.constant 0.000000e+00 : f32
    %13 = vector.broadcast %cst_11 : f32 to vector<8x128xf32>
    %14 = arith.maximumf %12, %13 : vector<8x128xf32>
    %c0_12 = arith.constant 0 : index
    %c0_13 = arith.constant 0 : index
    %15 = vector.load %arg6[%c0_12, %c0_13] : memref<128x128xf32, #tpu.memory_space<vmem>>, vector<128x128xf32>
    %cst_14 = arith.constant dense<0.000000e+00> : vector<8x128xf32>
    %16 = tpu.matmul %14, %15, %cst_14 {dimension_numbers = #tpu.dot_dimension_numbers<[1], [0], [0], [1], [0, 0, 1, 1], [], []>} : vector<8x128xf32>, vector<128x128xf32>, vector<8x128xf32> -> vector<8x128xf32>
    %c0_15 = arith.constant 0 : index
    %c0_16 = arith.constant 0 : index
    %17 = vector.load %arg7[%c0_15, %c0_16] : memref<1x128xf32, #tpu.memory_space<vmem>>, vector<1x128xf32>
    %18 = vector.broadcast %17 : vector<1x128xf32> to vector<8x128xf32>
    %19 = arith.addf %16, %18 : vector<8x128xf32>
    %cst_17 = arith.constant dense<0xFF800000> : vector<8xf32>
    %20 = vector.multi_reduction <maximumf>, %19, %cst_17 [1] : vector<8x128xf32> to vector<8xf32>
    %21 = vector.shape_cast %20 : vector<8xf32> to vector<8x1xf32>
    %22 = vector.broadcast %21 : vector<8x1xf32> to vector<8x128xf32>
    %23 = arith.subf %19, %22 : vector<8x128xf32>
    %24 = math.exp %23 : vector<8x128xf32>
    %cst_18 = arith.constant dense<0.000000e+00> : vector<8xf32>
    %25 = vector.multi_reduction <add>, %24, %cst_18 [1] : vector<8x128xf32> to vector<8xf32>
    %26 = vector.shape_cast %25 : vector<8xf32> to vector<8x1xf32>
    %27 = math.log %26 : vector<8x1xf32>
    %28 = vector.broadcast %27 : vector<8x1xf32> to vector<8x128xf32>
    %29 = arith.subf %23, %28 : vector<8x128xf32>
    %c0_19 = arith.constant 0 : index
    %c0_20 = arith.constant 0 : index
    %30 = vector.load %arg8[%c0_19, %c0_20] : memref<8x128xf32, #tpu.memory_space<vmem>>, vector<8x128xf32>
    tpu.vector_store %arg8[%c0_19, %c0_20], %29 {strides = array<i32>} : memref<8x128xf32, #tpu.memory_space<vmem>>, vector<8x128xf32>,
    return
  }
  func.func @transform_0(%arg0: i32) -> (i32, i32) {
    %c0_i32 = arith.constant 0 : i32
    %c0_i32_0 = arith.constant 0 : i32
    return %arg0, %c0_i32 : i32, i32
  }
  func.func @transform_1(%arg0: i32) -> (i32, i32) {
    %c0_i32 = arith.constant 0 : i32
    %c0_i32_0 = arith.constant 0 : i32
    %c0_i32_1 = arith.constant 0 : i32
    return %c0_i32, %c0_i32_0 : i32, i32
  }
  func.func @transform_2(%arg0: i32) -> (i32, i32) {
    %c0_i32 = arith.constant 0 : i32
    %c0_i32_0 = arith.constant 0 : i32
    %c0_i32_1 = arith.constant 0 : i32
    return %c0_i32, %c0_i32_0 : i32, i32
  }
  func.func @transform_3(%arg0: i32) -> (i32, i32) {
    %c0_i32 = arith.constant 0 : i32
    %c0_i32_0 = arith.constant 0 : i32
    %c0_i32_1 = arith.constant 0 : i32
    return %c0_i32, %c0_i32_0 : i32, i32
  }
  func.func @transform_4(%arg0: i32) -> (i32, i32) {
    %c0_i32 = arith.constant 0 : i32
    %c0_i32_0 = arith.constant 0 : i32
    %c0_i32_1 = arith.constant 0 : i32
    return %c0_i32, %c0_i32_0 : i32, i32
  }
  func.func @transform_5(%arg0: i32) -> (i32, i32) {
    %c0_i32 = arith.constant 0 : i32
    %c0_i32_0 = arith.constant 0 : i32
    %c0_i32_1 = arith.constant 0 : i32
    return %c0_i32, %c0_i32_0 : i32, i32
  }
  func.func @transform_6(%arg0: i32) -> (i32, i32) {
    %c0_i32 = arith.constant 0 : i32
    %c0_i32_0 = arith.constant 0 : i32
    %c0_i32_1 = arith.constant 0 : i32
    return %c0_i32, %c0_i32_0 : i32, i32
  }
  func.func @transform_7(%arg0: i32) -> (i32, i32) {
    %c0_i32 = arith.constant 0 : i32
    %c0_i32_0 = arith.constant 0 : i32
    return %arg0, %c0_i32 : i32, i32
  }
}

</mosaic_0001>

<bundles_post_ra>
// kernel: tpu_custom_call.1
= control target key start
LH: loop header
LB: loop body
LE: loop exit
PB: predicated region body
PF: predicated region fallthrough
CT: control target
= control target key end

     0   :  { %12 = vsyncpa [#allocation3], 0  ;;  %s751_s0 = inlined_call_operand.hbm [shape: f32[8,32], index: 0, kind: input, shape index: {}]   ;;  %s752_s1 = inlined_call_operand.hbm [shape: f32[32,128], index: 1, kind: input, shape index: {}]   ;;  %s753_s2 = inlined_call_operand.vmem [shape: f32[1,128], index: 2, kind: input, shape index: {}]   ;;  %s754_s3 = inlined_call_operand.hbm [shape: f32[128,128], index: 3, kind: input, shape index: {}]   ;;  %s755_s4 = inlined_call_operand.vmem [shape: f32[1,128], index: 4, kind: input, shape index: {}]   ;;  %s756_s5 = inlined_call_operand.hbm [shape: f32[128,128], index: 5, kind: input, shape index: {}]   ;;  %s757_s6 = inlined_call_operand.vmem [shape: f32[1,128], index: 6, kind: input, shape index: {}]   ;;  %s758_s7 = inlined_call_operand.hbm [shape: f32[8,128], index: 7, kind: output, shape index: {}]  }
   0x1   :  { %13 = vsyncpa [#allocation6], 0 }
   0x2   :  { %14 = vsyncpa [#allocation9], 0 }
   0x3   :  { %15 = vsyncpa [#allocation4], 0  ;;  %s627_s24 = smov [#allocation5]  }
   0x4   :  { %s31_s25 = sshll.u32 %s627_s24, 4  ;;  %s32_s25 = int_to_ptr.vmem [resolvable:$true] %s31_s25 }
   0x5   :  { %s527_s26 = scalar_lea.vmem %s32_s25, 512  ;;  %p532_p1 = scmp.lt.s32.totalorder %s32_s25, %s32_s25 }
   0x6   :  { %p528_p0 = scmp.ne.s32.totalorder %s32_s25, %s527_s26  ;;  %p533_p2 = scmp.lt.s32.totalorder %s527_s26, %s527_s26 }
   0x8   :  { %p534_p3 = por %p533_p2, %p532_p1 }
   0xa   :  { %p535_p4 = pnand %p534_p3, %p528_p0 }
   0xc   :  { %538 = shalt.err (!%p535_p4)
}
   0xd   :  { %s628_s27 = smov 128   ;;  %s629_s28 = smov 8  }
   0xe   :  { %37 = dma.hbm_to_vmem [thread:$0]  %s752_s1, 512, %s32_s25, [#allocation6], %s628_s27, %s628_s27, %s629_s28  }
   0xf   :  { %s630_s8 = smov [#allocation2]   ;;  %s631_s10 = smov [#allocation7]  }
  0x10   :  { %s22_s9 = sshll.u32 %s630_s8, 4  ;;  %s45_s11 = sshll.u32 %s631_s10, 4  ;;  %s23_s9 = int_to_ptr.vmem [resolvable:$true] %s22_s9  ;;  %s46_s11 = int_to_ptr.vmem [resolvable:$true] %s45_s11 }
  0x11   :  { %s547_s12 = scalar_lea.vmem %s23_s9, 128  ;;  %p552_p6 = scmp.lt.s32.totalorder %s23_s9, %s23_s9 }
  0x12   :  { %p548_p5 = scmp.ne.s32.totalorder %s23_s9, %s547_s12  ;;  %p553_p7 = scmp.lt.s32.totalorder %s547_s12, %s547_s12 }
  0x14   :  { %p554_p8 = por %p553_p7, %p552_p6 }
  0x16   :  { %p555_p9 = pnand %p554_p8, %p548_p5 }
  0x18   :  { %558 = shalt.err (!%p555_p9)
}
  0x19   :  { %25 = dma.hbm_to_vmem [thread:$0]  %s751_s0, 128, %s23_s9, [#allocation3]  }
  0x1a   :  { %s567_s15 = scalar_lea.vmem %s46_s11, 2048  ;;  %p572_p11 = scmp.lt.s32.totalorder %s46_s11, %s46_s11 }
  0x1b   :  { %p568_p10 = scmp.ne.s32.totalorder %s46_s11, %s567_s15  ;;  %p573_p12 = scmp.lt.s32.totalorder %s567_s15, %s567_s15 }
  0x1d   :  { %p574_p13 = por %p573_p12, %p572_p11 }
  0x1f   :  { %p575_p0 = pnand %p574_p13, %p568_p10 }
  0x21   :  { %578 = shalt.err (!%p575_p0)
}
  0x22   :  { %51 = dma.hbm_to_vmem [thread:$0]  %s754_s3, 2048, %s46_s11, [#allocation6], %s628_s27, %s628_s27, %s629_s28  }
  0x23   :  { %s632_s17 = smov [#allocation8]  }
  0x24   :  { %s59_s18 = sshll.u32 %s632_s17, 4  ;;  %s60_s18 = int_to_ptr.vmem [resolvable:$true] %s59_s18 }
  0x25   :  { %s587_s19 = scalar_lea.vmem %s60_s18, 2048  ;;  %p592_p2 = scmp.lt.s32.totalorder %s60_s18, %s60_s18 }
  0x26   :  { %p588_p1 = scmp.ne.s32.totalorder %s60_s18, %s587_s19  ;;  %p593_p3 = scmp.lt.s32.totalorder %s587_s19, %s587_s19 }
  0x28   :  { %p594_p4 = por %p593_p3, %p592_p2 }
  0x2a   :  { %p595_p5 = pnand %p594_p4, %p588_p1 }
  0x2c   :  { %598 = shalt.err (!%p595_p5)
}
  0x2d   :  { %65 = dma.hbm_to_vmem [thread:$0]  %s756_s5, 2048, %s60_s18, [#allocation9], %s628_s27, %s628_s27, %s629_s28  }
  0x2e   :  { %619 = dma.done.wait [#allocation3], 128  }
  0x2f   :  { %620 = vsyncadd [#allocation3], 4294967168 }
  0x30   :  { %621 = dma.done.wait [#allocation6], 2560  }
  0x31   :  { %622 = vsyncadd [#allocation6], 4294964736 }
  0x32   :  { %623 = dma.done.wait [#allocation9], 2048  }
  0x33   :  { %624 = vsyncadd [#allocation9], 4294965248  ;;  %v633_v0 = vmov 0.0   ;;  %vm634_vm0 = vmmov 0   ;;  %v84_v1 = vld [vmem:[#allocation5 + $0x18] sm:$0xff]  ;;  %v83_v2 = vld [vmem:[#allocation5 + $0x10] sm:$0xff] }
  0x34   :  { %425 = vmatprep.subr.mxu0 %v633_v0  ;;  %433 = vmatprep.mubr.msk.f32.mxu0 %vm634_vm0, %v633_v0  ;;  %v182_v3 = vld [vmem:[#allocation7 + $0x78] sm:$0xff]  ;;  %v82_v4 = vld [vmem:[#allocation5 + $0x8] sm:$0xff]  ;;  %v181_v5 = vld [vmem:[#allocation7 + $0x70] sm:$0xff]  ;;  %vm92_vm1 = vcmask 261120  }
  0x35   :  { %436 = vmatprep.subr.mxu1 %v633_v0  ;;  %468 = vmatprep.mubr.msk.f32.mxu1 %vm634_vm0, %v633_v0  ;;  %v180_v6 = vld [vmem:[#allocation7 + $0x68] sm:$0xff]  ;;  %v81_v7 = vld [vmem:[#allocation5] sm:$0xff]  ;;  %v80_v8 = vld [vmem:[#allocation2] sm:$0xff] }
  0x36   :  { %426 = vmatpush3.msra.mxu0 %v84_v1  ;;  %437 = vmatpush3.msra.mxu1 %v182_v3  ;;  %v179_v9 = vld [vmem:[#allocation7 + $0x60] sm:$0xff]  ;;  %v178_v10 = vld [vmem:[#allocation7 + $0x58] sm:$0xff]  ;;  %v177_v11 = vld [vmem:[#allocation7 + $0x50] sm:$0xff] }
  0x37   :  { %427 = vmatprep.subr.mxu0 %v633_v0  ;;  %438 = vmatprep.subr.mxu1 %v633_v0  ;;  %v176_v12 = vld [vmem:[#allocation7 + $0x48] sm:$0xff]  ;;  %v175_v13 = vld [vmem:[#allocation7 + $0x40] sm:$0xff]  ;;  %v174_v14 = vld [vmem:[#allocation7 + $0x38] sm:$0xff] }
  0x38   :  { %428 = vmatpush3.msra.mxu0 %v83_v2  ;;  %439 = vmatpush3.msra.mxu1 %v181_v5  ;;  %v173_v15 = vld [vmem:[#allocation7 + $0x30] sm:$0xff]  ;;  %v172_v16 = vld [vmem:[#allocation7 + $0x28] sm:$0xff]  ;;  %v171_v17 = vld [vmem:[#allocation7 + $0x20] sm:$0xff] }
  0x39   :  { %429 = vmatprep.subr.mxu0 %v633_v0  ;;  %440 = vmatprep.subr.mxu1 %v633_v0  ;;  %v170_v18 = vld [vmem:[#allocation7 + $0x18] sm:$0xff]  ;;  %v169_v19 = vld [vmem:[#allocation7 + $0x10] sm:$0xff]  ;;  %v168_v20 = vld [vmem:[#allocation7 + $0x8] sm:$0xff] }
  0x3a   :  { %430 = vmatpush3.msra.mxu0 %v82_v4  ;;  %441 = vmatpush3.msra.mxu1 %v180_v6  ;;  %v167_v21 = vld [vmem:[#allocation7] sm:$0xff]  ;;  %v276_v22 = vld [vmem:[#allocation8 + $0x78] sm:$0xff]  ;;  %v275_v23 = vld [vmem:[#allocation8 + $0x70] sm:$0xff] }
  0x3b   :  { %431 = vmatprep.subr.mxu0 %v633_v0  ;;  %442 = vmatprep.subr.mxu1 %v633_v0  ;;  %v274_v24 = vld [vmem:[#allocation8 + $0x68] sm:$0xff]  ;;  %v273_v25 = vld [vmem:[#allocation8 + $0x60] sm:$0xff]  ;;  %v272_v26 = vld [vmem:[#allocation8 + $0x58] sm:$0xff] }
  0x3c   :  { %432 = vmatpush3.msra.mxu0 %v81_v7  ;;  %443 = vmatpush3.msra.mxu1 %v179_v9  ;;  %v271_v27 = vld [vmem:[#allocation8 + $0x50] sm:$0xff]  ;;  %v270_v28 = vld [vmem:[#allocation8 + $0x48] sm:$0xff]  ;;  %v269_v29 = vld [vmem:[#allocation8 + $0x40] sm:$0xff] }
  0x3d   :  { %434 = vmatmul.mubr.msk.f32.vlgmr.msra.gmra.mxu0 %vm92_vm1, %v80_v8  ;;  %444 = vmatprep.subr.mxu1 %v633_v0  ;;  %v268_v30 = vld [vmem:[#allocation8 + $0x38] sm:$0xff]  ;;  %v267_v31 = vld [vmem:[#allocation8 + $0x30] sm:$0xff]  ;;  %v266_v32 = vld [vmem:[#allocation8 + $0x28] sm:$0xff] }
  0x3e   :  { %471 = vmatprep.subr.mxu0 %v633_v0  ;;  %445 = vmatpush3.msra.mxu1 %v178_v10  ;;  %v265_v33 = vld [vmem:[#allocation8 + $0x20] sm:$0xff]  ;;  %v264_v34 = vld [vmem:[#allocation8 + $0x18] sm:$0xff]  ;;  %v263_v40 = vld [vmem:[#allocation8 + $0x10] sm:$0xff] }
  0x3f   :  { %503 = vmatprep.mubr.msk.f32.mxu0 %vm634_vm0, %v633_v0  ;;  %446 = vmatprep.subr.mxu1 %v633_v0  ;;  %v382_v35 = vld [vmem:[%s753_s2] ss:$0 sm:$0xff]  ;;  %v262_v41 = vld [vmem:[#allocation8 + $0x8] sm:$0xff]  ;;  %v261_v42 = vld [vmem:[#allocation8] sm:$0xff] }
  0x40   :  { %447 = vmatpush3.msra.mxu1 %v177_v11  ;;  %472 = vmatpush3.msra.mxu0 %v276_v22  ;;  %v384_v43 = vld [vmem:[%s755_s4] ss:$0 sm:$0xff]  ;;  %s635_s4 = smov [#allocation10]  }
  0x41   :  { %448 = vmatprep.subr.mxu1 %v633_v0  ;;  %473 = vmatprep.subr.mxu0 %v633_v0  ;;  %v385_v48 = vld [vmem:[%s757_s6] ss:$0 sm:$0xff]  ;;  %s371_s24 = sshll.u32 %s635_s4, 4  ;;  %s372_s24 = int_to_ptr.vmem [resolvable:$true] %s371_s24 }
  0x42   :  { %449 = vmatpush3.msra.mxu1 %v176_v12  ;;  %474 = vmatpush3.msra.mxu0 %v275_v23  ;;  %s599_s6 = scalar_lea.vmem %s372_s24, 128  ;;  %p604_p7 = scmp.lt.s32.totalorder %s372_s24, %s372_s24 }
  0x43   :  { %450 = vmatprep.subr.mxu1 %v633_v0  ;;  %475 = vmatprep.subr.mxu0 %v633_v0  ;;  %p600_p6 = scmp.ne.s32.totalorder %s372_s24, %s599_s6  ;;  %p605_p8 = scmp.lt.s32.totalorder %s599_s6, %s599_s6 }
  0x44   :  { %451 = vmatpush3.msra.mxu1 %v175_v13  ;;  %476 = vmatpush3.msra.mxu0 %v274_v24 }
  0x45   :  { %452 = vmatprep.subr.mxu1 %v633_v0  ;;  %477 = vmatprep.subr.mxu0 %v633_v0  ;;  %p606_p9 = por %p605_p8, %p604_p7 }
  0x46   :  { %453 = vmatpush3.msra.mxu1 %v174_v14  ;;  %478 = vmatpush3.msra.mxu0 %v273_v25 }
  0x47   :  { %454 = vmatprep.subr.mxu1 %v633_v0  ;;  %479 = vmatprep.subr.mxu0 %v633_v0  ;;  %p607_p10 = pnand %p606_p9, %p600_p6 }
  0x48   :  { %455 = vmatpush3.msra.mxu1 %v173_v15  ;;  %480 = vmatpush3.msra.mxu0 %v272_v26 }
  0x49   :  { %456 = vmatprep.subr.mxu1 %v633_v0  ;;  %481 = vmatprep.subr.mxu0 %v633_v0 }
  0x4a   :  { %457 = vmatpush3.msra.mxu1 %v172_v16  ;;  %482 = vmatpush3.msra.mxu0 %v271_v27 }
  0x4b   :  { %458 = vmatprep.subr.mxu1 %v633_v0  ;;  %483 = vmatprep.subr.mxu0 %v633_v0 }
  0x4c   :  { %459 = vmatpush3.msra.mxu1 %v171_v17  ;;  %484 = vmatpush3.msra.mxu0 %v270_v28 }
  0x4d   :  { %460 = vmatprep.subr.mxu1 %v633_v0  ;;  %485 = vmatprep.subr.mxu0 %v633_v0 }
  0x4e   :  { %461 = vmatpush3.msra.mxu1 %v170_v18  ;;  %486 = vmatpush3.msra.mxu0 %v269_v29 }
  0x4f   :  { %462 = vmatprep.subr.mxu1 %v633_v0  ;;  %487 = vmatprep.subr.mxu0 %v633_v0 }
  0x50   :  { %463 = vmatpush3.msra.mxu1 %v169_v19  ;;  %488 = vmatpush3.msra.mxu0 %v268_v30 }
  0x51   :  { %464 = vmatprep.subr.mxu1 %v633_v0  ;;  %489 = vmatprep.subr.mxu0 %v633_v0 }
  0x52   :  { %465 = vmatpush3.msra.mxu1 %v168_v20  ;;  %490 = vmatpush3.msra.mxu0 %v267_v31 }
  0x53   :  { %466 = vmatprep.subr.mxu1 %v633_v0  ;;  %491 = vmatprep.subr.mxu0 %v633_v0 }
  0x54   :  { %467 = vmatpush3.msra.mxu1 %v167_v21  ;;  %492 = vmatpush3.msra.mxu0 %v266_v32 }
  0x55   :  { %493 = vmatprep.subr.mxu0 %v633_v0 }
  0x56   :  { %494 = vmatpush3.msra.mxu0 %v265_v33 }
  0x57   :  { %495 = vmatprep.subr.mxu0 %v633_v0 }
  0x58   :  { %496 = vmatpush3.msra.mxu0 %v264_v34 }
  0x59   :  { %497 = vmatprep.subr.mxu0 %v633_v0 }
  0x5a   :  { %498 = vmatpush3.msra.mxu0 %v263_v40 }
  0x5b   :  { %499 = vmatprep.subr.mxu0 %v633_v0 }
  0x5c   :  { %500 = vmatpush3.msra.mxu0 %v262_v41 }
  0x5d   :  { %501 = vmatprep.subr.mxu0 %v633_v0 }
  0x5e   :  { %502 = vmatpush3.msra.mxu0 %v261_v42 }
  0xfd   :  { %v162_v36 = vpop.f32.mrf.mxu0 }
  0xfe   :  { %v163_v37 = vadd.f32 %v382_v35, %v162_v36 }
  0xff   :  { %v435_v38 = vpop.f32.mrf.mxu0 }
 0x100   :  { %v166_v39 = vmax.f32 %v163_v37, 0.0 }
 0x102   :  { %469 = vmatmul.mubr.f32.vlgmr.msra.gmra.mxu1 %v166_v39 }
 0x1c2   :  { %v256_v44 = vpop.f32.mrf.mxu1 }
 0x1c3   :  { %v257_v45 = vadd.f32 %v384_v43, %v256_v44 }
 0x1c4   :  { %v470_v46 = vpop.f32.mrf.mxu1 }
 0x1c5   :  { %v260_v47 = vmax.f32 %v257_v45, 0.0 }
 0x1c7   :  { %504 = vmatmul.mubr.f32.vlgmr.msra.gmra.mxu0 %v260_v47 }
 0x287   :  { %v350_v49 = vpop.f32.mrf.mxu0 }
 0x288   :  { %v351_v50 = vadd.f32 %v385_v48, %v350_v49 }
 0x289   :  { %v505_v51 = vpop.f32.mrf.mxu0 }
 0x28a   :  { %354 = vmax.xlane.f32.xlu0 %v351_v50 }
 0x313   :  { %v355_v52 = vpop.xlane.xlu0 %354 }
 0x314   :  { %v356_v53 = vsub.f32 %v351_v50, %v355_v52 }
 0x316   :  { %v357_v54 = vmul.f32 1.442695, %v356_v53 }
 0x318   :  { %515 = vpow2.f32 %v357_v54 }
 0x325   :  { %v516_v55 = vpop.eup %515 }
 0x326   :  { %359 = vadd.xlane.f32.xlu0 %v516_v55 }
 0x3af   :  { %v360_v56 = vpop.xlane.xlu0 %359 }
 0x3b0   :  { %517 = vlog2.f32 %v360_v56 }
 0x3bd   :  { %v518_v57 = vpop.eup %517 }
 0x3be   :  { %v362_v58 = vmul.f32 0.6931472, %v518_v57 }
 0x3c0   :  { %v363_v59 = vsub.f32 %v356_v53, %v362_v58 }
 0x3c2   :  { %364 = vst [vmem:[#allocation10] sm:$0xff] %v363_v59 }
 0x3c3   :  { %610 = shalt.err (!%p607_p10)
}
 0x3c4   :  { %374 = dma.vmem_to_hbm [thread:$0]  %s372_s24, 128, %s758_s7, [#allocation4]  }
 0x3c5   :  { %625 = dma.done.wait [#allocation4], 128  }
 0x3c6   :  { %626 = vsyncadd [#allocation4], 4294967168 }
 0x3c7   :  { %378 = vsyncpa [#allocation3], 1 }
 0x3c8   :  { %379 = vsyncpa [#allocation6], 1 }
 0x3c9   :  { %380 = vsyncpa [#allocation9], 1 }
 0x3ca   :  { %381 = vsyncpa [#allocation4], 1 }

</bundles_post_ra>
